<compile_context>
chip_gen: v7x
topology: tpu7x:2x2x1
jax: 0.10.0
libtpu: 0.0.40
codegen_flags: <defaults>
</compile_context>

<pallas_src>
import functools

import jax
import jax.numpy as jnp
from jax.experimental import pallas as pl
from jax.experimental.pallas import tpu as pltpu

# ----------------------------------------------------------------------------
# Problem sizes (small, synthetic)
# ----------------------------------------------------------------------------
N_NODES = 16          # total nodes across the batch of graphs
N_GRAPHS = 2          # number of graphs in the batch
N_EDGES = 24          # total edges
N_FEATURES = 8        # n_features
HIDDEN_DIM = 32       # hidden_dim of the filtration MLP
N_FILT = 4            # n_filtrations
OUT_DIM = 16          # out_dim of set_fn
BN_EPS = 1e-5
AGGREGATION_FN = "mean"   # scatter reduce used by the DeepSet layers

# ----------------------------------------------------------------------------
# Packed-parameter layout (single (112, 32) f32 buffer, one input DMA).
# Row offsets are multiples of 8 for the weight blocks (sublane-aligned).
# ----------------------------------------------------------------------------
LANE_W = max(HIDDEN_DIM, OUT_DIM, N_FEATURES)      # 32 — common lane width

_ROW_FW1 = 0                                       # (F, H)   filtration Linear#1
_ROW_W01 = _ROW_FW1 + N_FEATURES                   # (H, D)   fw2 ∘ persistence ∘ set_fn[0]
_ROW_WS1 = _ROW_W01 + HIDDEN_DIM                   # (2D, D)  [Gamma1; -Lambda1]
_ROW_WS2 = _ROW_WS1 + 2 * OUT_DIM                  # (2D, F)  [Gamma2; -Lambda2]
_ROW_BIAS = _ROW_WS2 + 2 * OUT_DIM                 # bias rows start here (104)
_ROW_FB1 = _ROW_BIAS + 0
_ROW_B01 = _ROW_BIAS + 1
_ROW_G1B = _ROW_BIAS + 2
_ROW_G2B = _ROW_BIAS + 3
_ROW_BNW = _ROW_BIAS + 4
_ROW_BNB = _ROW_BIAS + 5
_N_PARAM_ROWS = ((_ROW_BIAS + 6 + 7) // 8) * 8     # 112 (sublane-padded)


# ----------------------------------------------------------------------------
# Fused TOGL kernel
# ----------------------------------------------------------------------------
def togl_kernel(x_ref, batch_ref, p_ref, out_ref, *, num_graphs):
    f32 = jnp.float32
    x = x_ref[...]                                                  # (N, F)

    # --- static slices of the packed parameter buffer (free views) ---------
    fw1 = p_ref[_ROW_FW1:_ROW_W01, 0:HIDDEN_DIM]                    # (F, H)
    w01 = p_ref[_ROW_W01:_ROW_WS1, 0:OUT_DIM]                       # (H, D)
    ws1 = p_ref[_ROW_WS1:_ROW_WS2, 0:OUT_DIM]                       # (2D, D)
    ws2 = p_ref[_ROW_WS2:_ROW_BIAS, 0:N_FEATURES]                   # (2D, F)
    fb1 = p_ref[_ROW_FB1:_ROW_FB1 + 1, 0:HIDDEN_DIM]                # (1, H)
    b01 = p_ref[_ROW_B01:_ROW_B01 + 1, 0:OUT_DIM]                   # (1, D)
    g1b = p_ref[_ROW_G1B:_ROW_G1B + 1, 0:OUT_DIM]                   # (1, D)
    g2b = p_ref[_ROW_G2B:_ROW_G2B + 1, 0:N_FEATURES]                # (1, F)
    bnw = p_ref[_ROW_BNW:_ROW_BNW + 1, 0:N_FEATURES]                # (1, F)
    bnb = p_ref[_ROW_BNB:_ROW_BNB + 1, 0:N_FEATURES]                # (1, F)

    # --- filtration MLP layer 1 ---------------------------------------------
    h = jnp.dot(x, fw1, preferred_element_type=f32) + fb1           # (N, H)
    h = jnp.maximum(h, 0.0)

    # TODO(synk): gudhi SimplexTree lower-star persistence has no Pallas/JAX
    # equivalent; the module's empty-generator fallback is used, and together
    # with filtration Linear#2 it is folded into w01/b01 at pack time.
    # set_fn[0] Linear + set_fn[1] ReLU:
    h0 = jnp.dot(h, w01, preferred_element_type=f32) + b01          # (N, D)
    h0 = jnp.maximum(h0, 0.0)

    # --- per-graph mean projector P (N, N), computed once -------------------
    # P[i, j] = 1/|graph(i)|  if batch[i] == batch[j] else 0, so
    # P @ h == scatter_mean(h, batch)[batch].
    b_row = batch_ref[...]                                          # (1, N) int32
    n = b_row.shape[1]
    gid = jax.lax.broadcasted_iota(jnp.int32, (num_graphs, n), 0)   # (G, N)
    onehot_t = (b_row == gid).astype(f32)                           # (G, N)
    counts = jnp.maximum(jnp.sum(onehot_t, axis=1, keepdims=True), 1.0)
    onehot_mean_t = onehot_t * pl.reciprocal(counts, approx=True)   # (G, N)
    proj = jax.lax.dot_general(onehot_t, onehot_mean_t,
                               (((0,), (0,)), ((), ())),
                               preferred_element_type=f32)          # (N, N)

    # --- set_fn[2]: DeepSetLayer(D, D) + set_fn[3]: ReLU ---------------------
    #   x @ Gamma + b - (P @ x) @ Lambda == concat([x, P@x], 1) @ [Gamma; -Lambda] + b
    ph0 = jnp.dot(proj, h0, preferred_element_type=f32)             # (N, D)
    h1 = jnp.dot(jnp.concatenate([h0, ph0], axis=1), ws1,
                 preferred_element_type=f32) + g1b                  # (N, D)
    h1 = jnp.maximum(h1, 0.0)

    # --- set_fn[4]: DeepSetLayer(D, F) ---------------------------------------
    ph1 = jnp.dot(proj, h1, preferred_element_type=f32)             # (N, D)
    x0 = jnp.dot(jnp.concatenate([h1, ph1], axis=1), ws2,
                 preferred_element_type=f32) + g2b                  # (N, F)

    # --- x + BatchNorm1d(relu(x0)), training-mode batch stats (biased var) ---
    r = jnp.maximum(x0, 0.0)
    inv_n = 1.0 / r.shape[0]
    mu = jnp.sum(r, axis=0, keepdims=True) * inv_n
    e2 = jnp.sum(r * r, axis=0, keepdims=True) * inv_n
    var = e2 - mu * mu
    y = (r - mu) * jax.lax.rsqrt(var + BN_EPS) * bnw + bnb

    out_ref[...] = (x + y).astype(out_ref.dtype)


# ----------------------------------------------------------------------------
# Host-side parameter folding + packing (done ONCE, outside the jit).
# ----------------------------------------------------------------------------
def pack_params(params):
    # Persistence empty-generator fallback duplicates every filtration column
    # (interleaved birth/death per filtration after permute+reshape):
    #   x0 @ win == filt_v @ (win[0::2] + win[1::2])
    win_folded = params["win"][0::2] + params["win"][1::2]          # (n_filt, D)
    # No nonlinearity between filtration Linear#2 and set_fn Linear#0 -> fold.
    w01 = params["f_w2"] @ win_folded                               # (H, D)
    b01 = params["f_b2"] @ win_folded + params["bin"]               # (1, D)
    # DeepSet stacked weights.
    ws1 = jnp.concatenate([params["g1w"], -params["l1w"]], axis=0)  # (2D, D)
    ws2 = jnp.concatenate([params["g2w"], -params["l2w"]], axis=0)  # (2D, F)

    def padw(a):
        a = a.astype(jnp.float32)
        return jnp.pad(a, ((0, 0), (0, LANE_W - a.shape[1])))

    blocks = [padw(params["f_w1"]), padw(w01), padw(ws1), padw(ws2),
              padw(params["f_b1"]), padw(b01), padw(params["g1b"]),
              padw(params["g2b"]), padw(params["bnw"]), padw(params["bnb"])]
    packed = jnp.concatenate(blocks, axis=0)                        # (110, 32)
    packed = jnp.pad(packed, ((0, _N_PARAM_ROWS - packed.shape[0]), (0, 0)))
    return packed                                                   # (112, 32)


# ----------------------------------------------------------------------------
# Wrapper: single pallas_call, whole arrays VMEM-resident (no grid — every
# tensor is far below one (8,128) tile, so tiling/pipelining is pure overhead).
# The output aliases the node-feature input (one fewer HBM buffer).
# ----------------------------------------------------------------------------
def togl_forward(x, edge_index, batch_row, p_packed):
    # TODO(synk): edge_index only feeds the gudhi persistence step, which is
    # not representable in Pallas; only the empty-generator fallback is used.
    del edge_index

    vmem = pl.BlockSpec(memory_space=pltpu.MemorySpace.VMEM)
    return pl.pallas_call(
        functools.partial(togl_kernel, num_graphs=N_GRAPHS),
        out_shape=jax.ShapeDtypeStruct(x.shape, jnp.float32),
        in_specs=[vmem, vmem, vmem],
        out_specs=vmem,
        input_output_aliases={0: 0},        # write the residual output over x
    )(x, batch_row, p_packed)


# ----------------------------------------------------------------------------
# Deterministic parameter init (PyTorch Linear shapes, stored as [in, out])
# ----------------------------------------------------------------------------
def init_params(key):
    ks = jax.random.split(key, 10)

    def lin(k, din, dout):
        s = 1.0 / jnp.sqrt(jnp.float32(din))
        kw, kb = jax.random.split(k)
        w = jax.random.uniform(kw, (din, dout), jnp.float32, -s, s)
        b = jax.random.uniform(kb, (1, dout), jnp.float32, -s, s)
        return w, b

    p = {}
    p["f_w1"], p["f_b1"] = lin(ks[0], N_FEATURES, HIDDEN_DIM)
    p["f_w2"], p["f_b2"] = lin(ks[1], HIDDEN_DIM, N_FILT)
    p["win"], p["bin"] = lin(ks[2], 2 * N_FILT, OUT_DIM)
    p["g1w"], p["g1b"] = lin(ks[3], OUT_DIM, OUT_DIM)
    p["l1w"], _ = lin(ks[4], OUT_DIM, OUT_DIM)        # Lambda: no bias
    p["g2w"], p["g2b"] = lin(ks[5], OUT_DIM, N_FEATURES)
    p["l2w"], _ = lin(ks[6], OUT_DIM, N_FEATURES)     # Lambda: no bias
    p["bnw"] = jnp.ones((1, N_FEATURES), jnp.float32)   # BatchNorm1d default init
    p["bnb"] = jnp.zeros((1, N_FEATURES), jnp.float32)
    return p


if __name__ == "__main__":
    key = jax.random.PRNGKey(0)
    k_x, k_e, k_p = jax.random.split(key, 3)

    # node features
    x = jax.random.normal(k_x, (N_NODES, N_FEATURES), jnp.float32)

    # batch assignment: first half of the nodes -> graph 0, second half -> graph 1
    nodes_per_graph = N_NODES // N_GRAPHS
    batch = jnp.repeat(jnp.arange(N_GRAPHS, dtype=jnp.int32), nodes_per_graph)
    batch_row = batch.reshape(1, N_NODES)              # (1, N) int32, lane-dense

    # edges: random, kept within each graph's node range (only the gudhi
    # persistence step would consume them; see TODO in togl_forward).
    e_per_graph = N_EDGES // N_GRAPHS
    src, dst = [], []
    for g in range(N_GRAPHS):
        kg = jax.random.fold_in(k_e, g)
        ks_, kd = jax.random.split(kg)
        lo = g * nodes_per_graph
        src.append(jax.random.randint(ks_, (e_per_graph,), lo, lo + nodes_per_graph))
        dst.append(jax.random.randint(kd, (e_per_graph,), lo, lo + nodes_per_graph))
    edge_index = jnp.stack([jnp.concatenate(src), jnp.concatenate(dst)]).astype(jnp.int32)

    params = init_params(k_p)
    p_packed = pack_params(params)                      # one-time fold + pack

    fwd = jax.jit(togl_forward, donate_argnums=(0,))    # donate x -> output aliases it
    out = fwd(x, edge_index, batch_row, p_packed)
    jax.block_until_ready(out)
    assert out.shape == (N_NODES, N_FEATURES)
    print("KERNEL_OK")
</pallas_src>

<mosaic_0001>
module attributes {stable_mosaic.version = 11 : i64} {
  func.func @togl_kernel(%arg0: memref<16x8xf32, #tpu.memory_space<vmem>>, %arg1: memref<1x16xi32, #tpu.memory_space<vmem>>, %arg2: memref<112x32xf32, #tpu.memory_space<vmem>>, %arg3: memref<16x8xf32, #tpu.memory_space<vmem>>) attributes {dimension_semantics = [], scalar_prefetch = 0 : i64, scratch_operands = 0 : i64, tpu.core_type = #tpu.core_type<tc>} {
    %c0 = arith.constant 0 : index
    %c0_0 = arith.constant 0 : index
    %0 = vector.load %arg0[%c0, %c0_0] : memref<16x8xf32, #tpu.memory_space<vmem>>, vector<16x8xf32>
    %c0_1 = arith.constant 0 : index
    %c0_2 = arith.constant 0 : index
    %1 = vector.load %arg2[%c0_1, %c0_2] : memref<112x32xf32, #tpu.memory_space<vmem>>, vector<8x32xf32>
    %c8 = arith.constant 8 : index
    %c0_3 = arith.constant 0 : index
    %2 = vector.load %arg2[%c8, %c0_3] : memref<112x32xf32, #tpu.memory_space<vmem>>, vector<32x16xf32>
    %c40 = arith.constant 40 : index
    %c0_4 = arith.constant 0 : index
    %3 = vector.load %arg2[%c40, %c0_4] : memref<112x32xf32, #tpu.memory_space<vmem>>, vector<32x16xf32>
    %c72 = arith.constant 72 : index
    %c0_5 = arith.constant 0 : index
    %4 = vector.load %arg2[%c72, %c0_5] : memref<112x32xf32, #tpu.memory_space<vmem>>, vector<32x8xf32>
    %c104 = arith.constant 104 : index
    %c0_6 = arith.constant 0 : index
    %5 = vector.load %arg2[%c104, %c0_6] : memref<112x32xf32, #tpu.memory_space<vmem>>, vector<1x32xf32>
    %c105 = arith.constant 105 : index
    %c0_7 = arith.constant 0 : index
    %6 = vector.load %arg2[%c105, %c0_7] : memref<112x32xf32, #tpu.memory_space<vmem>>, vector<1x16xf32>
    %c106 = arith.constant 106 : index
    %c0_8 = arith.constant 0 : index
    %7 = vector.load %arg2[%c106, %c0_8] : memref<112x32xf32, #tpu.memory_space<vmem>>, vector<1x16xf32>
    %c107 = arith.constant 107 : index
    %c0_9 = arith.constant 0 : index
    %8 = vector.load %arg2[%c107, %c0_9] : memref<112x32xf32, #tpu.memory_space<vmem>>, vector<1x8xf32>
    %c108 = arith.constant 108 : index
    %c0_10 = arith.constant 0 : index
    %9 = vector.load %arg2[%c108, %c0_10] : memref<112x32xf32, #tpu.memory_space<vmem>>, vector<1x8xf32>
    %c109 = arith.constant 109 : index
    %c0_11 = arith.constant 0 : index
    %10 = vector.load %arg2[%c109, %c0_11] : memref<112x32xf32, #tpu.memory_space<vmem>>, vector<1x8xf32>
    %cst = arith.constant dense<0.000000e+00> : vector<16x32xf32>
    %11 = tpu.matmul %0, %1, %cst {dimension_numbers = #tpu.dot_dimension_numbers<[1], [0], [0], [1], [0, 0, 1, 1], [], []>} : vector<16x8xf32>, vector<8x32xf32>, vector<16x32xf32> -> vector<16x32xf32>
    %12 = vector.broadcast %5 : vector<1x32xf32> to vector<16x32xf32>
    %13 = arith.addf %11, %12 : vector<16x32xf32>
    %cst_12 = arith.constant 0.000000e+00 : f32
    %14 = vector.broadcast %cst_12 : f32 to vector<16x32xf32>
    %15 = arith.maximumf %13, %14 : vector<16x32xf32>
    %cst_13 = arith.constant dense<0.000000e+00> : vector<16x16xf32>
    %16 = tpu.matmul %15, %2, %cst_13 {dimension_numbers = #tpu.dot_dimension_numbers<[1], [0], [0], [1], [0, 0, 1, 1], [], []>} : vector<16x32xf32>, vector<32x16xf32>, vector<16x16xf32> -> vector<16x16xf32>
    %17 = vector.broadcast %6 : vector<1x16xf32> to vector<16x16xf32>
    %18 = arith.addf %16, %17 : vector<16x16xf32>
    %cst_14 = arith.constant 0.000000e+00 : f32
    %19 = vector.broadcast %cst_14 : f32 to vector<16x16xf32>
    %20 = arith.maximumf %18, %19 : vector<16x16xf32>
    %c0_15 = arith.constant 0 : index
    %c0_16 = arith.constant 0 : index
    %21 = vector.load %arg1[%c0_15, %c0_16] : memref<1x16xi32, #tpu.memory_space<vmem>>, vector<1x16xi32>
    %22 = tpu.iota {dimensions = array<i32: 0>} : vector<2x16xi32>
    %23 = vector.broadcast %21 : vector<1x16xi32> to vector<2x16xi32>
    %24 = arith.cmpi eq, %23, %22 : vector<2x16xi32>
    %25 = arith.extui %24 : vector<2x16xi1> to vector<2x16xi32>
    %26 = arith.sitofp %25 : vector<2x16xi32> to vector<2x16xf32>
    %cst_17 = arith.constant dense<0.000000e+00> : vector<2xf32>
    %27 = vector.multi_reduction <add>, %26, %cst_17 [1] : vector<2x16xf32> to vector<2xf32>
    %28 = vector.shape_cast %27 : vector<2xf32> to vector<2x1xf32>
    %cst_18 = arith.constant 1.000000e+00 : f32
    %29 = vector.broadcast %cst_18 : f32 to vector<2x1xf32>
    %30 = arith.maximumf %28, %29 : vector<2x1xf32>
    %31 = tpu.reciprocal %30 {approx = true} : vector<2x1xf32> -> vector<2x1xf32>
    %32 = vector.broadcast %31 : vector<2x1xf32> to vector<2x16xf32>
    %33 = arith.mulf %26, %32 : vector<2x16xf32>
    %cst_19 = arith.constant dense<0.000000e+00> : vector<16x16xf32>
    %34 = tpu.matmul %26, %33, %cst_19 {dimension_numbers = #tpu.dot_dimension_numbers<[0], [0], [1], [1], [0, 1, 1, 1], [], []>} : vector<2x16xf32>, vector<2x16xf32>, vector<16x16xf32> -> vector<16x16xf32>
    %cst_20 = arith.constant dense<0.000000e+00> : vector<16x16xf32>
    %35 = tpu.matmul %34, %20, %cst_20 {dimension_numbers = #tpu.dot_dimension_numbers<[1], [0], [0], [1], [0, 0, 1, 1], [], []>} : vector<16x16xf32>, vector<16x16xf32>, vector<16x16xf32> -> vector<16x16xf32>
    %36 = tpu.concatenate %20, %35 in 1 : vector<16x16xf32>, vector<16x16xf32> -> vector<16x32xf32>
    %cst_21 = arith.constant dense<0.000000e+00> : vector<16x16xf32>
    %37 = tpu.matmul %36, %3, %cst_21 {dimension_numbers = #tpu.dot_dimension_numbers<[1], [0], [0], [1], [0, 0, 1, 1], [], []>} : vector<16x32xf32>, vector<32x16xf32>, vector<16x16xf32> -> vector<16x16xf32>
    %38 = vector.broadcast %7 : vector<1x16xf32> to vector<16x16xf32>
    %39 = arith.addf %37, %38 : vector<16x16xf32>
    %cst_22 = arith.constant 0.000000e+00 : f32
    %40 = vector.broadcast %cst_22 : f32 to vector<16x16xf32>
    %41 = arith.maximumf %39, %40 : vector<16x16xf32>
    %cst_23 = arith.constant dense<0.000000e+00> : vector<16x16xf32>
    %42 = tpu.matmul %34, %41, %cst_23 {dimension_numbers = #tpu.dot_dimension_numbers<[1], [0], [0], [1], [0, 0, 1, 1], [], []>} : vector<16x16xf32>, vector<16x16xf32>, vector<16x16xf32> -> vector<16x16xf32>
    %43 = tpu.concatenate %41, %42 in 1 : vector<16x16xf32>, vector<16x16xf32> -> vector<16x32xf32>
    %cst_24 = arith.constant dense<0.000000e+00> : vector<16x8xf32>
    %44 = tpu.matmul %43, %4, %cst_24 {dimension_numbers = #tpu.dot_dimension_numbers<[1], [0], [0], [1], [0, 0, 1, 1], [], []>} : vector<16x32xf32>, vector<32x8xf32>, vector<16x8xf32> -> vector<16x8xf32>
    %45 = vector.broadcast %8 : vector<1x8xf32> to vector<16x8xf32>
    %46 = arith.addf %44, %45 : vector<16x8xf32>
    %cst_25 = arith.constant 0.000000e+00 : f32
    %47 = vector.broadcast %cst_25 : f32 to vector<16x8xf32>
    %48 = arith.maximumf %46, %47 : vector<16x8xf32>
    %cst_26 = arith.constant dense<0.000000e+00> : vector<8xf32>
    %49 = vector.multi_reduction <add>, %48, %cst_26 [0] : vector<16x8xf32> to vector<8xf32>
    %50 = vector.shape_cast %49 : vector<8xf32> to vector<1x8xf32>
    %cst_27 = arith.constant 6.250000e-02 : f32
    %51 = vector.broadcast %cst_27 : f32 to vector<1x8xf32>
    %52 = arith.mulf %50, %51 : vector<1x8xf32>
    %53 = arith.mulf %48, %48 : vector<16x8xf32>
    %cst_28 = arith.constant dense<0.000000e+00> : vector<8xf32>
    %54 = vector.multi_reduction <add>, %53, %cst_28 [0] : vector<16x8xf32> to vector<8xf32>
    %55 = vector.shape_cast %54 : vector<8xf32> to vector<1x8xf32>
    %cst_29 = arith.constant 6.250000e-02 : f32
    %56 = vector.broadcast %cst_29 : f32 to vector<1x8xf32>
    %57 = arith.mulf %55, %56 : vector<1x8xf32>
    %58 = arith.mulf %52, %52 : vector<1x8xf32>
    %59 = arith.subf %57, %58 : vector<1x8xf32>
    %60 = vector.broadcast %52 : vector<1x8xf32> to vector<16x8xf32>
    %61 = arith.subf %48, %60 : vector<16x8xf32>
    %cst_30 = arith.constant 9.99999974E-6 : f32
    %62 = vector.broadcast %cst_30 : f32 to vector<1x8xf32>
    %63 = arith.addf %59, %62 : vector<1x8xf32>
    %64 = math.rsqrt %63 : vector<1x8xf32>
    %65 = vector.broadcast %64 : vector<1x8xf32> to vector<16x8xf32>
    %66 = arith.mulf %61, %65 : vector<16x8xf32>
    %67 = vector.broadcast %9 : vector<1x8xf32> to vector<16x8xf32>
    %68 = arith.mulf %66, %67 : vector<16x8xf32>
    %69 = vector.broadcast %10 : vector<1x8xf32> to vector<16x8xf32>
    %70 = arith.addf %68, %69 : vector<16x8xf32>
    %71 = arith.addf %0, %70 : vector<16x8xf32>
    %c0_31 = arith.constant 0 : index
    %c0_32 = arith.constant 0 : index
    %72 = vector.load %arg3[%c0_31, %c0_32] : memref<16x8xf32, #tpu.memory_space<vmem>>, vector<16x8xf32>
    tpu.vector_store %arg3[%c0_31, %c0_32], %71 {strides = array<i32>} : memref<16x8xf32, #tpu.memory_space<vmem>>, vector<16x8xf32>,
    return
  }
}

</mosaic_0001>

<bundles_post_ra>
// kernel: togl_forward.1
= control target key start
LH: loop header
LB: loop body
LE: loop exit
PB: predicated region body
PF: predicated region fallthrough
CT: control target
= control target key end

     0   :  { %vm39_vm0 = vcmask 64512   ;;  %v212_v0 = vlaneseq  ;;  %vm221_vm1 = vcmask 123904   ;;  %v897_v6 = vmov 0.0   ;;  %s898_s11 = smov 16   ;;  %s1025_s2 = inlined_call_operand.vmem [shape: f32[112,32], index: 2, kind: input, shape index: {}]   ;;  %s1026_s0 = inlined_call_operand.vmem [shape: f32[16,8], index: 0, kind: input, shape index: {}, may-alias: {0,3}]   ;;  %s1027_s1 = inlined_call_operand.vmem [shape: s32[1,16], index: 1, kind: input, shape index: {}]   ;;  %s1028_s3 = inlined_call_operand.vmem [shape: f32[16,8], index: 3, kind: output, shape index: {}, may-alias: {0,3}]  }
   0x1   :  { %v16_v1 = vld [vmem:[%s1025_s2] sm:$0xff]  ;;  %v930_v3 = vld [vmem:[%s1026_s0 + $0x8] sm:$0xff]  ;;  %v18_v10 = vld [vmem:[%s1025_s2 + $0x10] sm:$0xff]  ;;  %vm267_vm3 = vcmask 1041408   ;;  %vm260_vm4 = vcmask 15360   ;;  %vm127_vm5 = vcmask 261120  }
   0x2   :  { %v925_v2 = vld [vmem:[%s1026_s0] sm:$0xff]  ;;  %802 = vmatprep.subr.mxu1 %v16_v1  ;;  %v213_v5 = vshrl.u32 %v212_v0, 7  ;;  %v17_v9 = vld [vmem:[%s1025_s2 + $0x8] sm:$0xff]  ;;  %v19_v12 = vld [vmem:[%s1025_s2 + $0x18] sm:$0xff]  ;;  %vm346_vm6 = vcmask 130048  }
   0x3   :  { %804 = vmatprep.mubr.msk.f32.mxu1 %vm39_vm0, %v925_v2  ;;  %v753_v4 = vld [vmem:[%s1027_s1] ss:$0 sm:$0xff]  ;;  %803 = vmatpush3.msra.mxu1 %v16_v1  ;;  %v859_v11 = vpack.c.bf16 %v18_v10, %v17_v9  ;;  %v747_v21 = vld [vmem:[%s1025_s2 + $0x68] ss:$0 sm:$0xff]  ;;  %v750_v30 = vld [vmem:[%s1025_s2 + $0x69] ss:$0 sm:$0xff] }
   0x4   :  { %805 = vmatmul.mubr.msk.f32.vlgmr.msra.gmra.mrb[0].mxu1 %vm39_vm0, %v930_v3  ;;  %vm218_vm2 = vcmp.eq.s32.totalorder %v753_v4, %v213_v5  ;;  %v20_v13 = vld [vmem:[%s1025_s2 + $0x20] sm:$0xff]  ;;  %v21_v38 = vld [vmem:[%s1025_s2 + $0x28] sm:$0xff]  ;;  %v22_v39 = vld [vmem:[%s1025_s2 + $0x30] sm:$0xff] }
   0x5   :  { %v754_v7 = vsel %vm218_vm2, 1.0, %v897_v6  ;;  %860 = vmatprep.subr.bf16.mxu1 %v859_v11  ;;  %v863_v14 = vpack.c.bf16 %v20_v13, %v19_v12  ;;  %v871_v40 = vpack.c.bf16 %v22_v39, %v21_v38  ;;  %v23_v41 = vld [vmem:[%s1025_s2 + $0x38] sm:$0xff]  ;;  %v24_v42 = vld [vmem:[%s1025_s2 + $0x40] sm:$0xff]  ;;  %v760_v50 = vld [vmem:[%s1025_s2 + $0x6a] ss:$0 sm:$0xff] }
   0x6   :  { %v222_v8 = vsel %vm221_vm1, %v754_v7, 0.0  ;;  %862 = vmatpush3.bf16.msra.mxu1 %v859_v11  ;;  %v875_v43 = vpack.c.bf16 %v24_v42, %v23_v41  ;;  %v25_v58 = vld [vmem:[%s1025_s2 + $0x48] sm:$0xff]  ;;  %v26_v59 = vld [vmem:[%s1025_s2 + $0x50] sm:$0xff]  ;;  %v27_v61 = vld [vmem:[%s1025_s2 + $0x58] sm:$0xff] }
   0x7   :  { %223 = vadd.xlane.f32.xlu0 %v222_v8  ;;  %864 = vmatprep.subr.bf16.mxu1 %v863_v14  ;;  %v883_v60 = vpack.c.bf16 %v26_v59, %v25_v58  ;;  %v28_v62 = vld [vmem:[%s1025_s2 + $0x60] sm:$0xff]  ;;  %v765_v8 = vld [vmem:[%s1025_s2 + $0x6b] ss:$0 sm:$0xff] }
   0x8   :  { %v887_v63 = vpack.c.bf16 %v28_v62, %v27_v61 }
   0xa   :  { %866 = vmatpush3.bf16.msra.mxu1 %v863_v14 }
   0xb   :  { %872 = vmatprep.subr.bf16.mxu1 %v871_v40 }
  0x34   :  { %228 = vxpose.xlu0.b32.start.end [1/1] (short) (narrow) %v754_v7, 16 }
  0x94   :  { %v224_v15 = vpop.xlane.xlu0 %223 }
  0x95   :  { %v225_v16 = vmax.f32 %v224_v15, 1.0 }
  0x97   :  { %893 = vrcp.f32 %v225_v16 }
  0xa1   :  { %v894_v17 = vpop.eup %893 }
  0xa2   :  { %v227_v18 = vmul.f32 %v894_v17, %v754_v7 }
  0xa4   :  { %818 = vmatprep.subr.msk.mxu0 %vm267_vm3, %v227_v18 }
  0xa5   :  { %819 = vmatpush3.msk.msra.mxu0 %vm267_vm3, %v227_v18 }
  0xb4   :  { %v244_v19 = vpop.trf.xlu0 }
  0xb5   :  { %820 = vmatprep.mubr.msk.f32.mxu0 %vm260_vm4, %v244_v19 }
  0xb8   :  { %v245_v20 = vpop.trf.xlu0 }
  0xb9   :  { %821 = vmatmul.mubr.msk.f32.vlgmr.msra.gmra.mrb[0].mxu0 %vm260_vm4, %v245_v20 }
  0xd7   :  { %v806_v22 = vpop.f32.mrb[0].mxu1 }
  0xd8   :  { %v118_v23 = vadd.f32 %v806_v22, %v747_v21  ;;  %v112_v24 = vpop.f32.mrb[1].mxu1 }
  0xd9   :  { %v113_v25 = vadd.f32 %v747_v21, %v112_v24 }
  0xda   :  { %v122_v27 = vmax.f32 %v118_v23, 0.0 }
  0xdb   :  { %v121_v26 = vmax.f32 %v113_v25, 0.0 }
  0xdd   :  { %815 = vmatprep.mubr.msk.f32.mxu1 %vm127_vm5, %v121_v26 }
  0xde   :  { %816 = vmatmul.mubr.msk.f32.vlgmr.msra.gmra.mrb[2].mxu1 %vm127_vm5, %v122_v27 }
  0xdf   :  { %874 = vmatpush3.bf16.msra.mxu1 %v871_v40 }
  0xe0   :  { %876 = vmatprep.subr.bf16.mxu1 %v875_v43 }
  0xe3   :  { %878 = vmatpush3.bf16.msra.mxu1 %v875_v43  ;;  %v768_v43 = vld [vmem:[%s1025_s2 + $0x6c] ss:$0 sm:$0xff] }
 0x18c   :  { %v822_v28 = vpop.f32.mrb[0].mxu0 }
 0x18d   :  { %v337_v29 = vpop.f32.mrb[1].mxu0 }
 0x18e   :  { %827 = vmatprep.mubr.msk.f32.mxu0 %vm346_vm6, %v337_v29 }
 0x1b1   :  { %v817_v31 = vpop.f32.mrb[2].mxu1 }
 0x1b2   :  { %v206_v32 = vadd.f32 %v817_v31, %v750_v30  ;;  %v200_v33 = vpop.f32.mrb[3].mxu1 }
 0x1b3   :  { %v201_v34 = vadd.f32 %v750_v30, %v200_v33 }
 0x1b4   :  { %v210_v35 = vmax.f32 %v206_v32, 0.0 }
 0x1b5   :  { %v209_v36 = vmax.f32 %v201_v34, 0.0 }
 0x1b7   :  { %v867_v37 = vpack.c.bf16 %v210_v35, %v209_v36 }
 0x1b9   :  { %868 = vmatprep.subr.bf16.mxu0 %v867_v37 }
 0x1ba   :  { %870 = vmatpush3.bf16.msra.mxu0 %v867_v37 }
 0x1bd   :  { %828 = vmatmul.mubr.msk.f32.vlgmr.msra.gmra.mrb[2].mxu0 %vm346_vm6, %v822_v28 }
 0x1be   :  { %845 = vmatprep.mubr.msk.f32.mxu0 %vm346_vm6, %v337_v29 }
 0x290   :  { %v829_v44 = vpop.f32.mrb[2].mxu0 }
 0x291   :  { %v419_v45 = vpop.f32.mrb[3].mxu0 }
 0x292   :  { %430 = vrot.lane.b32.xlu1 %v419_v45, %s898_s11 }
 0x296   :  { %432 = vrot.lane.b32.xlu1 %v829_v44, %s898_s11 }
 0x304   :  { %v431_v46 = vpop.permute.xlu1 %430 }
 0x305   :  { %v436_v47 = vsel %vm346_vm6, %v209_v36, %v431_v46  ;;  %v769_v46 = vld [vmem:[%s1025_s2 + $0x6d] ss:$0 sm:$0xff] }
 0x306   :  { %838 = vmatprep.mubr.msk.f32.mxu1 %vm127_vm5, %v436_v47 }
 0x308   :  { %v433_v48 = vpop.permute.xlu1 %432 }
 0x309   :  { %v437_v49 = vsel %vm346_vm6, %v210_v35, %v433_v48 }
 0x30a   :  { %839 = vmatmul.mubr.msk.f32.vlgmr.msra.gmra.mrb[4].mxu1 %vm127_vm5, %v437_v49 }
 0x3dd   :  { %v840_v51 = vpop.f32.mrb[4].mxu1 }
 0x3de   :  { %v520_v52 = vadd.f32 %v840_v51, %v760_v50  ;;  %v514_v53 = vpop.f32.mrb[5].mxu1 }
 0x3df   :  { %v515_v54 = vadd.f32 %v760_v50, %v514_v53 }
 0x3e0   :  { %v524_v55 = vmax.f32 %v520_v52, 0.0 }
 0x3e1   :  { %v523_v56 = vmax.f32 %v515_v54, 0.0 }
 0x3e3   :  { %v879_v57 = vpack.c.bf16 %v524_v55, %v523_v56 }
 0x3e5   :  { %880 = vmatprep.subr.bf16.mxu0 %v879_v57 }
 0x3e6   :  { %882 = vmatpush3.bf16.msra.mxu0 %v879_v57 }
 0x3e7   :  { %884 = vmatprep.subr.bf16.mxu0 %v883_v60 }
 0x3e9   :  { %846 = vmatmul.mubr.msk.f32.vlgmr.msra.gmra.mrb[4].mxu0 %vm346_vm6, %v822_v28 }
 0x3ea   :  { %886 = vmatpush3.bf16.msra.mxu0 %v883_v60 }
 0x3eb   :  { %888 = vmatprep.subr.bf16.mxu0 %v887_v63 }
 0x3ee   :  { %890 = vmatpush3.bf16.msra.mxu0 %v887_v63 }
 0x4bc   :  { %v847_v0 = vpop.f32.mrb[4].mxu0 }
 0x4bd   :  { %v591_v1 = vpop.f32.mrb[5].mxu0 }
 0x4be   :  { %602 = vrot.lane.b32.xlu1 %v591_v1, %s898_s11 }
 0x4c2   :  { %604 = vrot.lane.b32.xlu1 %v847_v0, %s898_s11 }
 0x530   :  { %v603_v4 = vpop.permute.xlu1 %602 }
 0x531   :  { %v608_v5 = vsel %vm346_vm6, %v523_v56, %v603_v4 }
 0x532   :  { %856 = vmatprep.mubr.msk.f32.mxu0 %vm127_vm5, %v608_v5 }
 0x534   :  { %v605_v6 = vpop.permute.xlu1 %604 }
 0x535   :  { %v609_v7 = vsel %vm346_vm6, %v524_v55, %v605_v6 }
 0x536   :  { %857 = vmatmul.mubr.msk.f32.vlgmr.msra.gmra.mrb[6].mxu0 %vm127_vm5, %v609_v7 }
 0x609   :  { %v858_v9 = vpop.f32.mrb[6].mxu0 }
 0x60a   :  { %v692_v10 = vadd.f32 %v858_v9, %v765_v8  ;;  %v686_v11 = vpop.f32.mrb[7].mxu0 }
 0x60b   :  { %v687_v12 = vadd.f32 %v765_v8, %v686_v11 }
 0x60c   :  { %v696_v13 = vmax.f32 %v692_v10, 0.0 }
 0x60d   :  { %v695_v14 = vmax.f32 %v687_v12, 0.0 }
 0x60e   :  { %v698_v15 = vsel %vm39_vm0, %v696_v13, 0.0  ;;  %v708_v16 = vmul.f32 %v696_v13, %v696_v13 }
 0x60f   :  { %v697_v17 = vsel %vm39_vm0, %v695_v14, 0.0  ;;  %v707_v18 = vmul.f32 %v695_v14, %v695_v14 }
 0x610   :  { %v710_v19 = vsel %vm39_vm0, %v708_v16, 0.0  ;;  %v699_v20 = vadd.f32 %v698_v15, %v697_v17 }
 0x611   :  { %v709_v21 = vsel %vm39_vm0, %v707_v18, 0.0 }
 0x612   :  { %v700_v22 = vrot.slane %v699_v20, 4  ;;  %v711_v23 = vadd.f32 %v710_v19, %v709_v21 }
 0x614   :  { %v701_v24 = vadd.f32 %v700_v22, %v699_v20  ;;  %v712_v25 = vrot.slane %v711_v23, 4 }
 0x616   :  { %v702_v26 = vrot.slane %v701_v24, 2  ;;  %v713_v27 = vadd.f32 %v712_v25, %v711_v23 }
 0x618   :  { %v703_v28 = vadd.f32 %v702_v26, %v701_v24  ;;  %v714_v29 = vrot.slane %v713_v27, 2 }
 0x61a   :  { %v704_v30 = vrot.slane %v703_v28, 1  ;;  %v715_v31 = vadd.f32 %v714_v29, %v713_v27 }
 0x61c   :  { %v705_v32 = vadd.f32 %v704_v30, %v703_v28  ;;  %v716_v33 = vrot.slane %v715_v31, 1 }
 0x61e   :  { %v706_v34 = vmul.f32 0.0625, %v705_v32  ;;  %v717_v35 = vadd.f32 %v716_v33, %v715_v31 }
 0x620   :  { %v718_v36 = vmul.f32 0.0625, %v717_v35  ;;  %v719_v37 = vmul.f32 %v706_v34, %v706_v34  ;;  %v721_v38 = vsub.f32 %v695_v14, %v706_v34  ;;  %v722_v39 = vsub.f32 %v696_v13, %v706_v34 }
 0x622   :  { %v720_v40 = vsub.f32 %v718_v36, %v719_v37 }
 0x624   :  { %v723_v41 = vadd.f32 1e-05, %v720_v40 }
 0x626   :  { %895 = vrsqrt.f32 %v723_v41 }
 0x630   :  { %v896_v42 = vpop.eup %895 }
 0x631   :  { %v725_v44 = vmul.f32 %v896_v42, %v721_v38  ;;  %v726_v45 = vmul.f32 %v896_v42, %v722_v39 }
 0x633   :  { %v731_v47 = vmul.f32 %v768_v43, %v725_v44  ;;  %v732_v48 = vmul.f32 %v768_v43, %v726_v45 }
 0x635   :  { %v737_v49 = vadd.f32 %v769_v46, %v731_v47  ;;  %v738_v50 = vadd.f32 %v769_v46, %v732_v48 }
 0x637   :  { %v739_v51 = vadd.f32 %v737_v49, %v925_v2  ;;  %v740_v52 = vadd.f32 %v738_v50, %v930_v3 }
 0x639   :  { %741 = vst.msk [vmem:[%s1028_s3] sm:$0xff] %vm39_vm0, %v739_v51  ;;  %742 = vst.msk [vmem:[%s1028_s3 + $0x8] sm:$0xff] %vm39_vm0, %v740_v52 }

</bundles_post_ra>
